<compile_context>
chip_gen: v7x
topology: tpu7x:2x2x1
jax: 0.10.0
libtpu: 0.0.40
codegen_flags: <defaults>
</compile_context>

<pallas_src>
import jax
import jax.numpy as jnp
from jax.experimental import pallas as pl
from jax.experimental.pallas import tpu as pltpu


def _round_up(x: int, m: int) -> int:
    return ((x + m - 1) // m) * m


def discriminator_kernel(x_ref, w1_ref, b1_ref, w2_ref, b2_ref, w3_ref, b3_ref,
                         o_ref):
    # x_ref: (D, tile_B)  -- batch in lanes (lane-dense).
    x = x_ref[...]
    h1 = jnp.dot(w1_ref[...], x, preferred_element_type=jnp.float32) + b1_ref[...]
    h1 = jnp.maximum(h1, 0.0)                                    # (16, tile_B)
    h2 = jnp.dot(w2_ref[...], h1, preferred_element_type=jnp.float32) + b2_ref[...]
    h2 = jnp.maximum(h2, 0.0)                                    # (16, tile_B)
    logits = jnp.dot(w3_ref[...], h2, preferred_element_type=jnp.float32) + b3_ref[...]
    o_ref[...] = jax.nn.sigmoid(logits).astype(o_ref.dtype)      # (1, tile_B)


def discriminator_forward(state, action, params, *, action_num, block_b=4096):
    """state: (B, state_dim) f32, action: (B,) int. Returns (B, 1) f32."""
    w1, b1, w2, b2, w3, b3 = params
    B = state.shape[0]

    # Build x^T directly (single fused pass: normalize + concat + transpose).
    a_row = (action.astype(state.dtype)
             / jnp.asarray(action_num, state.dtype)).reshape(1, -1)   # (1, B)
    xt = jnp.concatenate([state.T, a_row], axis=0)                    # (D, B)
    D = xt.shape[0]

    # Lane-dense batch tiling: pad B up to a multiple of the batch block.
    tile_b = max(128, min(block_b, _round_up(B, 128)))
    Bp = _round_up(B, tile_b)
    if Bp != B:
        xt = jnp.pad(xt, ((0, 0), (0, Bp - B)))

    grid = (Bp // tile_b,)

    # Weights/biases: full-array blocks with constant index_map -> resident in
    # VMEM, DMA'd once, never re-fetched across grid steps.
    def resident(a):
        return pl.BlockSpec(a.shape, lambda i, _nd=a.ndim: (0,) * _nd)

    out_t = pl.pallas_call(
        discriminator_kernel,
        out_shape=jax.ShapeDtypeStruct((1, Bp), jnp.float32),
        grid=grid,
        in_specs=[
            pl.BlockSpec((D, tile_b), lambda i: (0, i)),   # x^T: tiled over batch lanes
            resident(w1), resident(b1),
            resident(w2), resident(b2),
            resident(w3), resident(b3),
        ],
        out_specs=pl.BlockSpec((1, tile_b), lambda i: (0, i)),
        compiler_params=pltpu.CompilerParams(
            dimension_semantics=("parallel",)),
    )(xt, w1, b1, w2, b2, w3, b3)

    # (1, Bp) -> (B, 1)
    return out_t[0, :B].reshape(B, 1)


def init_params(key, state_dim, hidden=16):
    """nn.Linear-style U(-1/sqrt(fan_in), 1/sqrt(fan_in)) init.

    Weights stored (out, in) and biases (out, 1) for the transposed
    (batch-in-lanes) kernel layout.
    """
    ks = jax.random.split(key, 6)

    def lin(kw, kb, fan_in, fan_out):
        bound = 1.0 / jnp.sqrt(jnp.float32(fan_in))
        w = jax.random.uniform(kw, (fan_out, fan_in), jnp.float32, -bound, bound)
        b = jax.random.uniform(kb, (fan_out, 1), jnp.float32, -bound, bound)
        return w, b

    d_in = state_dim + 1
    w1, b1 = lin(ks[0], ks[1], d_in, hidden)
    w2, b2 = lin(ks[2], ks[3], hidden, hidden)
    w3, b3 = lin(ks[4], ks[5], hidden, 1)
    return (w1, b1, w2, b2, w3, b3)


def discriminator_ref(state, action, params, *, action_num):
    w1, b1, w2, b2, w3, b3 = params
    a_col = action.astype(state.dtype) / jnp.asarray(action_num, state.dtype)
    x = jnp.concatenate([state, a_col.reshape(-1, 1)], axis=1)
    h = jnp.maximum(x @ w1.T + b1.T, 0.0)
    h = jnp.maximum(h @ w2.T + b2.T, 0.0)
    return jax.nn.sigmoid(h @ w3.T + b3.T)


if __name__ == "__main__":
    key = jax.random.PRNGKey(0)
    k_state, k_action, k_params = jax.random.split(key, 3)

    batch, state_dim, action_num = 8, 4, 3
    state = jax.random.normal(k_state, (batch, state_dim), jnp.float32)
    action = jax.random.randint(k_action, (batch,), 0, action_num, jnp.int32)
    params = init_params(k_params, state_dim)

    out = discriminator_forward(state, action, params, action_num=action_num)
    out = jax.block_until_ready(out)

    ref = discriminator_ref(state, action, params, action_num=action_num)
    assert out.shape == (batch, 1), out.shape
    assert jnp.allclose(out, ref, atol=1e-5, rtol=1e-5), (out, ref)

    print("KERNEL_OK")
</pallas_src>

<mosaic_0001>
module attributes {stable_mosaic.version = 11 : i64} {
  func.func @discriminator_kernel(%arg0: i32, %arg1: memref<5x128xf32, #tpu.memory_space<vmem>>, %arg2: memref<16x5xf32, #tpu.memory_space<vmem>>, %arg3: memref<16x1xf32, #tpu.memory_space<vmem>>, %arg4: memref<16x16xf32, #tpu.memory_space<vmem>>, %arg5: memref<16x1xf32, #tpu.memory_space<vmem>>, %arg6: memref<1x16xf32, #tpu.memory_space<vmem>>, %arg7: memref<1x1xf32, #tpu.memory_space<vmem>>, %arg8: memref<1x128xf32, #tpu.memory_space<vmem>>) attributes {dimension_semantics = [#tpu.dimension_semantics<parallel>], iteration_bounds = array<i64: 1>, scalar_prefetch = 0 : i64, scratch_operands = 0 : i64, tpu.core_type = #tpu.core_type<tc>, window_params = [{transform_indices = @transform_0, window_bounds = array<i64: 5, 128>}, {pipeline_mode = #tpu.pipeline_mode<synchronous>, transform_indices = @transform_1, window_bounds = array<i64: 16, 5>}, {pipeline_mode = #tpu.pipeline_mode<synchronous>, transform_indices = @transform_2, window_bounds = array<i64: 16, 1>}, {pipeline_mode = #tpu.pipeline_mode<synchronous>, transform_indices = @transform_3, window_bounds = array<i64: 16, 16>}, {pipeline_mode = #tpu.pipeline_mode<synchronous>, transform_indices = @transform_4, window_bounds = array<i64: 16, 1>}, {pipeline_mode = #tpu.pipeline_mode<synchronous>, transform_indices = @transform_5, window_bounds = array<i64: 1, 16>}, {pipeline_mode = #tpu.pipeline_mode<synchronous>, transform_indices = @transform_6, window_bounds = array<i64: 1, 1>}, {transform_indices = @transform_7, window_bounds = array<i64: 1, 128>}]} {
    %c0 = arith.constant 0 : index
    %c0_0 = arith.constant 0 : index
    %0 = vector.load %arg1[%c0, %c0_0] : memref<5x128xf32, #tpu.memory_space<vmem>>, vector<5x128xf32>
    %c0_1 = arith.constant 0 : index
    %c0_2 = arith.constant 0 : index
    %1 = vector.load %arg2[%c0_1, %c0_2] : memref<16x5xf32, #tpu.memory_space<vmem>>, vector<16x5xf32>
    %cst = arith.constant dense<0.000000e+00> : vector<16x128xf32>
    %2 = tpu.matmul %1, %0, %cst {dimension_numbers = #tpu.dot_dimension_numbers<[1], [0], [0], [1], [0, 0, 1, 1], [], []>} : vector<16x5xf32>, vector<5x128xf32>, vector<16x128xf32> -> vector<16x128xf32>
    %c0_3 = arith.constant 0 : index
    %c0_4 = arith.constant 0 : index
    %3 = vector.load %arg3[%c0_3, %c0_4] : memref<16x1xf32, #tpu.memory_space<vmem>>, vector<16x1xf32>
    %4 = vector.broadcast %3 : vector<16x1xf32> to vector<16x128xf32>
    %5 = arith.addf %2, %4 : vector<16x128xf32>
    %cst_5 = arith.constant 0.000000e+00 : f32
    %6 = vector.broadcast %cst_5 : f32 to vector<16x128xf32>
    %7 = arith.maximumf %5, %6 : vector<16x128xf32>
    %c0_6 = arith.constant 0 : index
    %c0_7 = arith.constant 0 : index
    %8 = vector.load %arg4[%c0_6, %c0_7] : memref<16x16xf32, #tpu.memory_space<vmem>>, vector<16x16xf32>
    %cst_8 = arith.constant dense<0.000000e+00> : vector<16x128xf32>
    %9 = tpu.matmul %8, %7, %cst_8 {dimension_numbers = #tpu.dot_dimension_numbers<[1], [0], [0], [1], [0, 0, 1, 1], [], []>} : vector<16x16xf32>, vector<16x128xf32>, vector<16x128xf32> -> vector<16x128xf32>
    %c0_9 = arith.constant 0 : index
    %c0_10 = arith.constant 0 : index
    %10 = vector.load %arg5[%c0_9, %c0_10] : memref<16x1xf32, #tpu.memory_space<vmem>>, vector<16x1xf32>
    %11 = vector.broadcast %10 : vector<16x1xf32> to vector<16x128xf32>
    %12 = arith.addf %9, %11 : vector<16x128xf32>
    %cst_11 = arith.constant 0.000000e+00 : f32
    %13 = vector.broadcast %cst_11 : f32 to vector<16x128xf32>
    %14 = arith.maximumf %12, %13 : vector<16x128xf32>
    %c0_12 = arith.constant 0 : index
    %c0_13 = arith.constant 0 : index
    %15 = vector.load %arg6[%c0_12, %c0_13] : memref<1x16xf32, #tpu.memory_space<vmem>>, vector<1x16xf32>
    %cst_14 = arith.constant dense<0.000000e+00> : vector<1x128xf32>
    %16 = tpu.matmul %15, %14, %cst_14 {dimension_numbers = #tpu.dot_dimension_numbers<[1], [0], [0], [1], [0, 0, 1, 1], [], []>} : vector<1x16xf32>, vector<16x128xf32>, vector<1x128xf32> -> vector<1x128xf32>
    %c0_15 = arith.constant 0 : index
    %c0_16 = arith.constant 0 : index
    %17 = vector.load %arg7[%c0_15, %c0_16] : memref<1x1xf32, #tpu.memory_space<vmem>>, vector<1x1xf32>
    %18 = vector.broadcast %17 : vector<1x1xf32> to vector<1x128xf32>
    %19 = arith.addf %16, %18 : vector<1x128xf32>
    %20 = arith.negf %19 : vector<1x128xf32>
    %21 = math.exp %20 : vector<1x128xf32>
    %cst_17 = arith.constant 1.000000e+00 : f32
    %22 = vector.broadcast %cst_17 : f32 to vector<1x128xf32>
    %23 = arith.addf %22, %21 : vector<1x128xf32>
    %24 = arith.divf %22, %23 : vector<1x128xf32>
    %c0_18 = arith.constant 0 : index
    %c0_19 = arith.constant 0 : index
    %25 = vector.load %arg8[%c0_18, %c0_19] : memref<1x128xf32, #tpu.memory_space<vmem>>, vector<1x128xf32>
    tpu.vector_store %arg8[%c0_18, %c0_19], %24 {strides = array<i32>} : memref<1x128xf32, #tpu.memory_space<vmem>>, vector<1x128xf32>,
    return
  }
  func.func @transform_0(%arg0: i32) -> (i32, i32) {
    %c0_i32 = arith.constant 0 : i32
    %c0_i32_0 = arith.constant 0 : i32
    return %c0_i32, %arg0 : i32, i32
  }
  func.func @transform_1(%arg0: i32) -> (i32, i32) {
    %c0_i32 = arith.constant 0 : i32
    %c0_i32_0 = arith.constant 0 : i32
    %c0_i32_1 = arith.constant 0 : i32
    return %c0_i32, %c0_i32_0 : i32, i32
  }
  func.func @transform_2(%arg0: i32) -> (i32, i32) {
    %c0_i32 = arith.constant 0 : i32
    %c0_i32_0 = arith.constant 0 : i32
    %c0_i32_1 = arith.constant 0 : i32
    return %c0_i32, %c0_i32_0 : i32, i32
  }
  func.func @transform_3(%arg0: i32) -> (i32, i32) {
    %c0_i32 = arith.constant 0 : i32
    %c0_i32_0 = arith.constant 0 : i32
    %c0_i32_1 = arith.constant 0 : i32
    return %c0_i32, %c0_i32_0 : i32, i32
  }
  func.func @transform_4(%arg0: i32) -> (i32, i32) {
    %c0_i32 = arith.constant 0 : i32
    %c0_i32_0 = arith.constant 0 : i32
    %c0_i32_1 = arith.constant 0 : i32
    return %c0_i32, %c0_i32_0 : i32, i32
  }
  func.func @transform_5(%arg0: i32) -> (i32, i32) {
    %c0_i32 = arith.constant 0 : i32
    %c0_i32_0 = arith.constant 0 : i32
    %c0_i32_1 = arith.constant 0 : i32
    return %c0_i32, %c0_i32_0 : i32, i32
  }
  func.func @transform_6(%arg0: i32) -> (i32, i32) {
    %c0_i32 = arith.constant 0 : i32
    %c0_i32_0 = arith.constant 0 : i32
    %c0_i32_1 = arith.constant 0 : i32
    return %c0_i32, %c0_i32_0 : i32, i32
  }
  func.func @transform_7(%arg0: i32) -> (i32, i32) {
    %c0_i32 = arith.constant 0 : i32
    %c0_i32_0 = arith.constant 0 : i32
    return %c0_i32, %arg0 : i32, i32
  }
}

</mosaic_0001>

<bundles_post_ra>
// kernel: tpu_custom_call.1
= control target key start
LH: loop header
LB: loop body
LE: loop exit
PB: predicated region body
PF: predicated region fallthrough
CT: control target
= control target key end

     0   :  { %s506_s0 = inlined_call_operand.vmem [shape: f32[5,128], index: 0, kind: input, shape index: {}]   ;;  %s507_s1 = inlined_call_operand.vmem [shape: f32[16,5], index: 1, kind: input, shape index: {}]   ;;  %s508_s2 = inlined_call_operand.vmem [shape: f32[16,1], index: 2, kind: input, shape index: {}]   ;;  %s509_s3 = inlined_call_operand.vmem [shape: f32[16,16], index: 3, kind: input, shape index: {}]   ;;  %s510_s4 = inlined_call_operand.vmem [shape: f32[16,1], index: 4, kind: input, shape index: {}]   ;;  %s511_s5 = inlined_call_operand.vmem [shape: f32[1,16], index: 5, kind: input, shape index: {}]   ;;  %s512_s6 = inlined_call_operand.<no memory space> [shape: f32[1,1], index: 6, kind: input, shape index: {}]   ;;  %s513_s7 = inlined_call_operand.hbm [shape: f32[1,128], index: 7, kind: output, shape index: {}]  }
   0x1   :  { %v12_v0 = vstv %s512_s6 }
   0x2   :  { %13 = vst [vmem:[#allocation2] sm:$0x1] %v12_v0 }
   0x3   :  { %v29_v1 = vld [vmem:[%s506_s0] sm:$0x1f]  ;;  %vm51_vm0 = vcmask 1044480   ;;  %vm44_vm1 = vcmask 39936   ;;  %v31_v3 = vld [vmem:[%s507_s1 + $0x8] sm:$0xff]  ;;  %v413_v5 = vmov 0  }
   0x4   :  { %v30_v2 = vld [vmem:[%s507_s1] sm:$0xff]  ;;  %352 = vmatprep.subr.msk.mxu0 %vm51_vm0, %v29_v1  ;;  %383 = vset.pattern.permute.xlu0 %v413_v5 }
   0x5   :  { %354 = vmatprep.mubr.msk.f32.mxu0 %vm44_vm1, %v30_v2  ;;  %v32_v4 = vld [vmem:[%s508_s2] sm:$0xff]  ;;  %353 = vmatpush3.msk.msra.mxu0 %vm51_vm0, %v29_v1 }
   0x6   :  { %14 = vsyncpa [#allocation4], 0  ;;  %355 = vmatmul.mubr.msk.f32.vlgmr.msra.gmra.mrb[0].mxu0 %vm44_vm1, %v31_v3  ;;  %36 = vperm.xlu0 %383, %v32_v4   ;;  %v33_v6 = vld [vmem:[%s508_s2 + $0x8] sm:$0xff]  ;;  %v132_v8 = vld [vmem:[%s509_s3] sm:$0xff]  ;;  %vm146_vm2 = vcmask 130048   ;;  %v414_v21 = vmov 0.0|0.0   ;;  %v237_v33 = vlaneseq }
   0x7   :  { %384 = vset.pattern.permute.xlu1 %v413_v5  ;;  %361 = vmatprep.mubr.msk.f32.mxu1 %vm146_vm2, %v132_v8  ;;  %v134_v9 = vld [vmem:[%s510_s4] sm:$0xff]  ;;  %v135_v10 = vld [vmem:[%s510_s4 + $0x8] sm:$0xff]  ;;  %vm415_vm3 = vmmov 0   ;;  %v416_v22 = vmov 0.0  }
   0x8   :  { %138 = vperm.xlu1 %384, %v134_v9   ;;  %v133_v20 = vld [vmem:[%s509_s3 + $0x8] sm:$0xff]  ;;  %375 = vmatprep.subr.bf16.mxu0 %v414_v21  ;;  %v230_v32 = vld [vmem:[%s511_s5] sm:$0x1]  ;;  %v238_v34 = vshrl.u32 %v237_v33, 7  ;;  %s417_s3 = smov [#allocation3]  }
   0x9   :  { %v231_v7 = vld [vmem:[#allocation2] sm:$0x1]  ;;  %368 = vmatprep.mubr.msk.f32.mxu0 %vm415_vm3, %v416_v22  ;;  %s327_s18 = sshll.u32 %s417_s3, 4  ;;  %s328_s18 = int_to_ptr.vmem [resolvable:$true] %s327_s18 }
   0xa   :  { %41 = vperm.xlu0 %383, %v33_v6   ;;  %v239_v35 = vsub.s32 0, %v238_v34  ;;  %s389_s5 = scalar_lea.vmem %s328_s18, 16  ;;  %s393_s19 = scalar_lea.vmem %s328_s18, 32 }
   0xb   :  { %p390_p0 = scmp.ne.s32.totalorder %s328_s18, %s389_s5  ;;  %p394_p1 = scmp.lt.s32.totalorder %s328_s18, %s328_s18 }
   0xc   :  { %143 = vperm.xlu1 %384, %v135_v10   ;;  %p395_p2 = scmp.lt.s32.totalorder %s393_s19, %s389_s5 }
   0xe   :  { %234 = vperm.xlu0 %383, %v231_v7   ;;  %p396_p3 = por %p395_p2, %p394_p1 }
  0x10   :  { %p397_p4 = pnand %p396_p3, %p390_p0 }
  0x85   :  { %v37_v11 = vpop.permute.xlu0 %36 }
  0x87   :  { %v139_v23 = vpop.permute.xlu1 %138 }
  0x89   :  { %v42_v12 = vpop.permute.xlu0 %41 }
  0x8b   :  { %v144_v24 = vpop.permute.xlu1 %143 }
  0x8d   :  { %v235_v36 = vpop.permute.xlu0 %234 }
  0x8e   :  { %v240_v37 = vrot.slane %v235_v36, %v239_v35 }
  0xd9   :  { %v356_v13 = vpop.f32.mrb[0].mxu0 }
  0xda   :  { %v127_v14 = vadd.f32 %v356_v13, %v42_v12  ;;  %v121_v15 = vpop.f32.mrb[1].mxu0 }
  0xdb   :  { %v122_v16 = vadd.f32 %v121_v15, %v37_v11 }
  0xdc   :  { %v131_v17 = vmax.f32 %v127_v14, 0.0 }
  0xdd   :  { %v130_v18 = vmax.f32 %v122_v16, 0.0 }
  0xdf   :  { %v371_v19 = vpack.c.bf16 %v131_v17, %v130_v18 }
  0xe1   :  { %372 = vmatprep.subr.bf16.mxu1 %v371_v19 }
  0xe2   :  { %374 = vmatpush3.bf16.msra.mxu1 %v371_v19 }
  0xe5   :  { %362 = vmatmul.mubr.msk.f32.vlgmr.msra.gmra.mrb[0].mxu1 %vm146_vm2, %v133_v20 }
 0x1b8   :  { %v363_v25 = vpop.f32.mrb[0].mxu1 }
 0x1b9   :  { %v225_v26 = vadd.f32 %v363_v25, %v144_v24  ;;  %v219_v27 = vpop.f32.mrb[1].mxu1 }
 0x1ba   :  { %v220_v28 = vadd.f32 %v219_v27, %v139_v23 }
 0x1bb   :  { %v229_v29 = vmax.f32 %v225_v26, 0.0 }
 0x1bc   :  { %v228_v30 = vmax.f32 %v220_v28, 0.0 }
 0x1be   :  { %v376_v31 = vpack.c.bf16 %v229_v29, %v228_v30 }
 0x1c0   :  { %377 = vmatpush3.bf16.msra.mxu0 %v376_v31 }
 0x1c3   :  { %369 = vmatmul.mubr.msk.f32.vlgmr.msra.gmra.mrb[2].mxu0 %vm146_vm2, %v230_v32 }
 0x296   :  { %v310_v38 = vpop.f32.mrb[2].mxu0 }
 0x297   :  { %v311_v39 = vadd.f32 %v310_v38, %v240_v37  ;;  %v370_v40 = vpop.f32.mrb[3].mxu0 }
 0x299   :  { %v341_v41 = vmul.f32 -1.442695, %v311_v39 }
 0x29b   :  { %385 = vpow2.f32 %v341_v41 }
 0x2a5   :  { %v386_v42 = vpop.eup %385 }
 0x2a6   :  { %v317_v43 = vadd.f32 1.0, %v386_v42 }
 0x2a8   :  { %387 = vrcp.f32 %v317_v43 }
 0x2b2   :  { %v388_v44 = vpop.eup %387 }
 0x2b3   :  { %320 = vst [vmem:[#allocation3] sm:$0x1] %v388_v44 }
 0x2b4   :  { %400 = shalt.err (!%p397_p4)
}
 0x2b5   :  { %s401_s22 = scalar_lea.hbm %s513_s7, 16 }
 0x2b6   :  { %p402_p5 = scmp.ne.s32.totalorder %s513_s7, %s401_s22  ;;  %p405_p6 = scmp.lt.u32.totalorder %s401_s22, %s513_s7 }
 0x2b8   :  { %p407_p7 = pnand %p405_p6, %p402_p5 }
 0x2ba   :  { %410 = shalt.err (!%p407_p7)
}
 0x2bb   :  { %330 = dma.vmem_to_hbm [thread:$0]  %s328_s18, 16, %s513_s7, [#allocation4]  }
 0x2bc   :  { %411 = dma.done.wait [#allocation4], 16  }
 0x2bd   :  { %412 = vsyncadd [#allocation4], 4294967280 }
 0x2be   :  { %334 = vsyncpa [#allocation4], 1 }

</bundles_post_ra>
